<compile_context>
chip_gen: v5e
topology: v5e:2x2
jax: 0.10.0
libtpu: 0.0.40
codegen_flags: <defaults>
</compile_context>

<pallas_src>
import functools

import jax
import jax.numpy as jnp
from jax.experimental import pallas as pl
from jax.experimental.pallas import tpu as pltpu


def _rnn_kernel(x_ref, wih_ref, whh_ref, b_ref, wlin_ref, blin_ref, out_ref,
                xproj_ref, *, T, B):
    # Hoisted input projection: one (T*B, I) @ (I, H) matmul + combined bias,
    # written to VMEM scratch so the unrolled loop doesn't keep T*B*H f32 live
    # in vregs.
    xproj_ref[...] = (jnp.dot(x_ref[...], wih_ref[...],
                              preferred_element_type=jnp.float32)
                      + b_ref[...])

    whh = whh_ref[...]                    # (H, H), loaded once, loop-invariant
    H = whh.shape[1]

    h = jnp.zeros((B, H), jnp.float32)
    if T <= 32:
        # Small static T: fully unroll (LLO sees the whole chain).
        for t in range(T):
            pre = xproj_ref[t * B:(t + 1) * B, :] + jnp.dot(
                h, whh, preferred_element_type=jnp.float32)
            h = jnp.tanh(pre)
    else:
        # Larger T: chunk-unrolled fori_loop, xproj stays in VMEM scratch.
        def body(t, h):
            row = pl.multiple_of(t * B, 8)
            pre = xproj_ref[pl.ds(row, B), :] + jnp.dot(
                h, whh, preferred_element_type=jnp.float32)
            return jnp.tanh(pre)
        h = jax.lax.fori_loop(0, T, body, h, unroll=4)

    # Final Linear(H, 1) as VPU multiply + lane reduce (no N=1 MXU matmul);
    # scalar bias read from SMEM.
    out_ref[...] = (jnp.sum(h * wlin_ref[...], axis=1, keepdims=True)
                    + blin_ref[0])


def rnn_forward(x_btI, w_ih, w_hh, b_ih, b_hh, w_lin, b_lin):
    """x_btI: (B, T, I) batch_first like torch; weights in torch layout:
       w_ih:(H,I), w_hh:(H,H), b_ih:(H,), b_hh:(H,), w_lin:(1,H), b_lin:(1,)."""
    B, T, I = x_btI.shape
    H = w_hh.shape[0]

    # Pad batch to a multiple of 8 (sublane tile) — padded rows compute
    # harmless zero-input sequences and are sliced off at the end.
    pad = (-B) % 8
    if pad:
        x_btI = jnp.pad(x_btI, ((0, pad), (0, 0), (0, 0)))
    Bp = B + pad

    # Batch tile: as big as reasonable (<= 256 MXU rows) while dividing Bp.
    if Bp <= 256:
        batch_tile = Bp
    else:
        batch_tile = 256 if Bp % 256 == 0 else Bp
    nb = Bp // batch_tile

    # Layout plumbing (wrapper-side only): per batch tile, time-major flatten
    # so that row t*TB + b of a tile is timestep t of local batch element b.
    x_tiles = (x_btI.astype(jnp.float32)
               .reshape(nb, batch_tile, T, I)
               .transpose(0, 2, 1, 3)
               .reshape(nb, T * batch_tile, I))
    wih = jnp.transpose(w_ih).astype(jnp.float32)            # (I, H)
    whh = jnp.transpose(w_hh).astype(jnp.float32)            # (H, H)
    b = (b_ih + b_hh).reshape(1, H).astype(jnp.float32)      # (1, H)
    wlin = w_lin.reshape(1, H).astype(jnp.float32)           # (1, H) native
    blin = b_lin.reshape(1).astype(jnp.float32)              # (1,) scalar

    kernel = functools.partial(_rnn_kernel, T=T, B=batch_tile)

    out = pl.pallas_call(
        kernel,
        out_shape=jax.ShapeDtypeStruct((Bp, 1), jnp.float32),
        grid=(nb,),
        in_specs=[
            # x tile: (T*TB, I) per grid point (leading batch-tile dim squeezed)
            pl.BlockSpec((None, T * batch_tile, I), lambda i: (i, 0, 0)),
            pl.BlockSpec((I, H), lambda i: (0, 0)),           # wih
            pl.BlockSpec((H, H), lambda i: (0, 0)),           # whh
            pl.BlockSpec((1, H), lambda i: (0, 0)),           # combined bias
            pl.BlockSpec((1, H), lambda i: (0, 0)),           # wlin
            pl.BlockSpec(memory_space=pltpu.MemorySpace.SMEM),  # blin scalar
        ],
        out_specs=pl.BlockSpec((batch_tile, 1), lambda i: (i, 0)),
        scratch_shapes=[pltpu.VMEM((T * batch_tile, H), jnp.float32)],
        compiler_params=pltpu.CompilerParams(
            dimension_semantics=("parallel",)),
    )(x_tiles, wih, whh, b, wlin, blin)

    return out[:B] if pad else out


def rnn_forward_ref(x_btI, w_ih, w_hh, b_ih, b_hh, w_lin, b_lin):
    """Pure-JAX reference matching torch.nn.RNN + Linear forward."""
    B, T, I = x_btI.shape
    H = w_hh.shape[0]
    h = jnp.zeros((B, H), jnp.float32)

    def step(h, x_t):
        h = jnp.tanh(x_t @ w_ih.T + b_ih + h @ w_hh.T + b_hh)
        return h, None

    h_last, _ = jax.lax.scan(step, h, jnp.transpose(x_btI, (1, 0, 2)))
    return h_last @ w_lin.T + b_lin


if __name__ == "__main__":
    # Small shapes consistent with the module's forward: (batch, seq, input_size)
    B, T, I, H = 8, 8, 16, 128   # hidden_size default in RNNModel is 128

    key = jax.random.PRNGKey(0)
    k = jax.random.split(key, 7)
    bound = 1.0 / (H ** 0.5)     # torch default uniform(-1/sqrt(H), 1/sqrt(H))
    x     = jax.random.normal(k[0], (B, T, I), jnp.float32)
    w_ih  = jax.random.uniform(k[1], (H, I), jnp.float32, -bound, bound)
    w_hh  = jax.random.uniform(k[2], (H, H), jnp.float32, -bound, bound)
    b_ih  = jax.random.uniform(k[3], (H,),   jnp.float32, -bound, bound)
    b_hh  = jax.random.uniform(k[4], (H,),   jnp.float32, -bound, bound)
    w_lin = jax.random.uniform(k[5], (1, H), jnp.float32, -bound, bound)
    b_lin = jax.random.uniform(k[6], (1,),   jnp.float32, -bound, bound)

    out = rnn_forward(x, w_ih, w_hh, b_ih, b_hh, w_lin, b_lin)
    out = jax.block_until_ready(out)

    ref = rnn_forward_ref(x, w_ih, w_hh, b_ih, b_hh, w_lin, b_lin)
    assert out.shape == (B, 1)
    assert jnp.allclose(out, ref, atol=1e-4, rtol=1e-4), (out, ref)

    print("KERNEL_OK")
</pallas_src>

<mosaic_0001>
module attributes {stable_mosaic.version = 11 : i64} {
  func.func @_rnn_kernel(%arg0: i32, %arg1: memref<1x64x16xf32, #tpu.memory_space<vmem>>, %arg2: memref<16x128xf32, #tpu.memory_space<vmem>>, %arg3: memref<128x128xf32, #tpu.memory_space<vmem>>, %arg4: memref<1x128xf32, #tpu.memory_space<vmem>>, %arg5: memref<1x128xf32, #tpu.memory_space<vmem>>, %arg6: memref<1xf32, #tpu.memory_space<smem>>, %arg7: memref<8x1xf32, #tpu.memory_space<vmem>>, %arg8: memref<64x128xf32, #tpu.memory_space<vmem>>) attributes {dimension_semantics = [#tpu.dimension_semantics<parallel>], iteration_bounds = array<i64: 1>, scalar_prefetch = 0 : i64, scratch_operands = 1 : i64, tpu.core_type = #tpu.core_type<tc>, window_params = [{transform_indices = @transform_0, window_bounds = array<i64: 1, 64, 16>}, {pipeline_mode = #tpu.pipeline_mode<synchronous>, transform_indices = @transform_1, window_bounds = array<i64: 16, 128>}, {pipeline_mode = #tpu.pipeline_mode<synchronous>, transform_indices = @transform_2, window_bounds = array<i64: 128, 128>}, {pipeline_mode = #tpu.pipeline_mode<synchronous>, transform_indices = @transform_3, window_bounds = array<i64: 1, 128>}, {pipeline_mode = #tpu.pipeline_mode<synchronous>, transform_indices = @transform_4, window_bounds = array<i64: 1, 128>}, {transform_indices = @transform_5, window_bounds = array<i64: 1>}, {transform_indices = @transform_6, window_bounds = array<i64: 8, 1>}]} {
    %c0 = arith.constant 0 : index
    %c0_0 = arith.constant 0 : index
    %c0_1 = arith.constant 0 : index
    %0 = vector.load %arg1[%c0, %c0_0, %c0_1] : memref<1x64x16xf32, #tpu.memory_space<vmem>>, vector<1x64x16xf32>
    %1 = vector.shape_cast %0 : vector<1x64x16xf32> to vector<64x16xf32>
    %c0_2 = arith.constant 0 : index
    %c0_3 = arith.constant 0 : index
    %2 = vector.load %arg2[%c0_2, %c0_3] : memref<16x128xf32, #tpu.memory_space<vmem>>, vector<16x128xf32>
    %cst = arith.constant dense<0.000000e+00> : vector<64x128xf32>
    %3 = tpu.matmul %1, %2, %cst {dimension_numbers = #tpu.dot_dimension_numbers<[1], [0], [0], [1], [0, 0, 1, 1], [], []>} : vector<64x16xf32>, vector<16x128xf32>, vector<64x128xf32> -> vector<64x128xf32>
    %c0_4 = arith.constant 0 : index
    %c0_5 = arith.constant 0 : index
    %4 = vector.load %arg4[%c0_4, %c0_5] : memref<1x128xf32, #tpu.memory_space<vmem>>, vector<1x128xf32>
    %5 = vector.broadcast %4 : vector<1x128xf32> to vector<64x128xf32>
    %6 = arith.addf %3, %5 : vector<64x128xf32>
    %c0_6 = arith.constant 0 : index
    %c0_7 = arith.constant 0 : index
    %7 = vector.load %arg8[%c0_6, %c0_7] : memref<64x128xf32, #tpu.memory_space<vmem>>, vector<64x128xf32>
    tpu.vector_store %arg8[%c0_6, %c0_7], %6 {strides = array<i32>} : memref<64x128xf32, #tpu.memory_space<vmem>>, vector<64x128xf32>,
    %c0_8 = arith.constant 0 : index
    %c0_9 = arith.constant 0 : index
    %8 = vector.load %arg3[%c0_8, %c0_9] : memref<128x128xf32, #tpu.memory_space<vmem>>, vector<128x128xf32>
    %cst_10 = arith.constant 0.000000e+00 : f32
    %9 = vector.broadcast %cst_10 : f32 to vector<8x128xf32>
    %c0_11 = arith.constant 0 : index
    %c0_12 = arith.constant 0 : index
    %10 = vector.load %arg8[%c0_11, %c0_12] : memref<64x128xf32, #tpu.memory_space<vmem>>, vector<8x128xf32>
    %cst_13 = arith.constant dense<0.000000e+00> : vector<8x128xf32>
    %11 = tpu.matmul %9, %8, %cst_13 {dimension_numbers = #tpu.dot_dimension_numbers<[1], [0], [0], [1], [0, 0, 1, 1], [], []>} : vector<8x128xf32>, vector<128x128xf32>, vector<8x128xf32> -> vector<8x128xf32>
    %12 = arith.addf %10, %11 : vector<8x128xf32>
    %13 = math.tanh %12 : vector<8x128xf32>
    %c8 = arith.constant 8 : index
    %c0_14 = arith.constant 0 : index
    %14 = vector.load %arg8[%c8, %c0_14] : memref<64x128xf32, #tpu.memory_space<vmem>>, vector<8x128xf32>
    %cst_15 = arith.constant dense<0.000000e+00> : vector<8x128xf32>
    %15 = tpu.matmul %13, %8, %cst_15 {dimension_numbers = #tpu.dot_dimension_numbers<[1], [0], [0], [1], [0, 0, 1, 1], [], []>} : vector<8x128xf32>, vector<128x128xf32>, vector<8x128xf32> -> vector<8x128xf32>
    %16 = arith.addf %14, %15 : vector<8x128xf32>
    %17 = math.tanh %16 : vector<8x128xf32>
    %c16 = arith.constant 16 : index
    %c0_16 = arith.constant 0 : index
    %18 = vector.load %arg8[%c16, %c0_16] : memref<64x128xf32, #tpu.memory_space<vmem>>, vector<8x128xf32>
    %cst_17 = arith.constant dense<0.000000e+00> : vector<8x128xf32>
    %19 = tpu.matmul %17, %8, %cst_17 {dimension_numbers = #tpu.dot_dimension_numbers<[1], [0], [0], [1], [0, 0, 1, 1], [], []>} : vector<8x128xf32>, vector<128x128xf32>, vector<8x128xf32> -> vector<8x128xf32>
    %20 = arith.addf %18, %19 : vector<8x128xf32>
    %21 = math.tanh %20 : vector<8x128xf32>
    %c24 = arith.constant 24 : index
    %c0_18 = arith.constant 0 : index
    %22 = vector.load %arg8[%c24, %c0_18] : memref<64x128xf32, #tpu.memory_space<vmem>>, vector<8x128xf32>
    %cst_19 = arith.constant dense<0.000000e+00> : vector<8x128xf32>
    %23 = tpu.matmul %21, %8, %cst_19 {dimension_numbers = #tpu.dot_dimension_numbers<[1], [0], [0], [1], [0, 0, 1, 1], [], []>} : vector<8x128xf32>, vector<128x128xf32>, vector<8x128xf32> -> vector<8x128xf32>
    %24 = arith.addf %22, %23 : vector<8x128xf32>
    %25 = math.tanh %24 : vector<8x128xf32>
    %c32 = arith.constant 32 : index
    %c0_20 = arith.constant 0 : index
    %26 = vector.load %arg8[%c32, %c0_20] : memref<64x128xf32, #tpu.memory_space<vmem>>, vector<8x128xf32>
    %cst_21 = arith.constant dense<0.000000e+00> : vector<8x128xf32>
    %27 = tpu.matmul %25, %8, %cst_21 {dimension_numbers = #tpu.dot_dimension_numbers<[1], [0], [0], [1], [0, 0, 1, 1], [], []>} : vector<8x128xf32>, vector<128x128xf32>, vector<8x128xf32> -> vector<8x128xf32>
    %28 = arith.addf %26, %27 : vector<8x128xf32>
    %29 = math.tanh %28 : vector<8x128xf32>
    %c40 = arith.constant 40 : index
    %c0_22 = arith.constant 0 : index
    %30 = vector.load %arg8[%c40, %c0_22] : memref<64x128xf32, #tpu.memory_space<vmem>>, vector<8x128xf32>
    %cst_23 = arith.constant dense<0.000000e+00> : vector<8x128xf32>
    %31 = tpu.matmul %29, %8, %cst_23 {dimension_numbers = #tpu.dot_dimension_numbers<[1], [0], [0], [1], [0, 0, 1, 1], [], []>} : vector<8x128xf32>, vector<128x128xf32>, vector<8x128xf32> -> vector<8x128xf32>
    %32 = arith.addf %30, %31 : vector<8x128xf32>
    %33 = math.tanh %32 : vector<8x128xf32>
    %c48 = arith.constant 48 : index
    %c0_24 = arith.constant 0 : index
    %34 = vector.load %arg8[%c48, %c0_24] : memref<64x128xf32, #tpu.memory_space<vmem>>, vector<8x128xf32>
    %cst_25 = arith.constant dense<0.000000e+00> : vector<8x128xf32>
    %35 = tpu.matmul %33, %8, %cst_25 {dimension_numbers = #tpu.dot_dimension_numbers<[1], [0], [0], [1], [0, 0, 1, 1], [], []>} : vector<8x128xf32>, vector<128x128xf32>, vector<8x128xf32> -> vector<8x128xf32>
    %36 = arith.addf %34, %35 : vector<8x128xf32>
    %37 = math.tanh %36 : vector<8x128xf32>
    %c56 = arith.constant 56 : index
    %c0_26 = arith.constant 0 : index
    %38 = vector.load %arg8[%c56, %c0_26] : memref<64x128xf32, #tpu.memory_space<vmem>>, vector<8x128xf32>
    %cst_27 = arith.constant dense<0.000000e+00> : vector<8x128xf32>
    %39 = tpu.matmul %37, %8, %cst_27 {dimension_numbers = #tpu.dot_dimension_numbers<[1], [0], [0], [1], [0, 0, 1, 1], [], []>} : vector<8x128xf32>, vector<128x128xf32>, vector<8x128xf32> -> vector<8x128xf32>
    %40 = arith.addf %38, %39 : vector<8x128xf32>
    %41 = math.tanh %40 : vector<8x128xf32>
    %c0_28 = arith.constant 0 : index
    %c0_29 = arith.constant 0 : index
    %42 = vector.load %arg5[%c0_28, %c0_29] : memref<1x128xf32, #tpu.memory_space<vmem>>, vector<1x128xf32>
    %43 = vector.broadcast %42 : vector<1x128xf32> to vector<8x128xf32>
    %44 = arith.mulf %41, %43 : vector<8x128xf32>
    %cst_30 = arith.constant dense<0.000000e+00> : vector<8xf32>
    %45 = vector.multi_reduction <add>, %44, %cst_30 [1] : vector<8x128xf32> to vector<8xf32>
    %46 = vector.shape_cast %45 : vector<8xf32> to vector<8x1xf32>
    %c0_31 = arith.constant 0 : index
    %47 = memref.load %arg6[%c0_31] : memref<1xf32, #tpu.memory_space<smem>>
    %48 = vector.broadcast %47 : f32 to vector<8x1xf32>
    %49 = arith.addf %46, %48 : vector<8x1xf32>
    %c0_32 = arith.constant 0 : index
    %c0_33 = arith.constant 0 : index
    %50 = vector.load %arg7[%c0_32, %c0_33] : memref<8x1xf32, #tpu.memory_space<vmem>>, vector<8x1xf32>
    tpu.vector_store %arg7[%c0_32, %c0_33], %49 {strides = array<i32>} : memref<8x1xf32, #tpu.memory_space<vmem>>, vector<8x1xf32>,
    return
  }
  func.func @transform_0(%arg0: i32) -> (i32, i32, i32) {
    %c0_i32 = arith.constant 0 : i32
    %c0_i32_0 = arith.constant 0 : i32
    %c0_i32_1 = arith.constant 0 : i32
    return %arg0, %c0_i32, %c0_i32_0 : i32, i32, i32
  }
  func.func @transform_1(%arg0: i32) -> (i32, i32) {
    %c0_i32 = arith.constant 0 : i32
    %c0_i32_0 = arith.constant 0 : i32
    %c0_i32_1 = arith.constant 0 : i32
    return %c0_i32, %c0_i32_0 : i32, i32
  }
  func.func @transform_2(%arg0: i32) -> (i32, i32) {
    %c0_i32 = arith.constant 0 : i32
    %c0_i32_0 = arith.constant 0 : i32
    %c0_i32_1 = arith.constant 0 : i32
    return %c0_i32, %c0_i32_0 : i32, i32
  }
  func.func @transform_3(%arg0: i32) -> (i32, i32) {
    %c0_i32 = arith.constant 0 : i32
    %c0_i32_0 = arith.constant 0 : i32
    %c0_i32_1 = arith.constant 0 : i32
    return %c0_i32, %c0_i32_0 : i32, i32
  }
  func.func @transform_4(%arg0: i32) -> (i32, i32) {
    %c0_i32 = arith.constant 0 : i32
    %c0_i32_0 = arith.constant 0 : i32
    %c0_i32_1 = arith.constant 0 : i32
    return %c0_i32, %c0_i32_0 : i32, i32
  }
  func.func @transform_5(%arg0: i32) -> i32 {
    %c0_i32 = arith.constant 0 : i32
    %c0_i32_0 = arith.constant 0 : i32
    return %c0_i32 : i32
  }
  func.func @transform_6(%arg0: i32) -> (i32, i32) {
    %c0_i32 = arith.constant 0 : i32
    %c0_i32_0 = arith.constant 0 : i32
    return %arg0, %c0_i32 : i32, i32
  }
}

</mosaic_0001>

<bundles_post_ra>
// kernel: tpu_custom_call.1
= control target key start
LH: loop header
LB: loop body
LE: loop exit
PB: predicated region body
PF: predicated region fallthrough
CT: control target
= control target key end

     0   :  { %12 = vsyncpa [#allocation5], 0  ;;  %s401_s24 = smov [#allocation4]   ;;  %s402_s26 = smov 128   ;;  %s663_s0 = inlined_call_operand.vmem [shape: f32[1,64,16], index: 0, kind: input, shape index: {}]   ;;  %s664_s1 = inlined_call_operand.vmem [shape: f32[16,128], index: 1, kind: input, shape index: {}]   ;;  %s665_s2 = inlined_call_operand.hbm [shape: f32[128,128], index: 2, kind: input, shape index: {}]   ;;  %s666_s3 = inlined_call_operand.vmem [shape: f32[1,128], index: 3, kind: input, shape index: {}]   ;;  %s667_s4 = inlined_call_operand.vmem [shape: f32[1,128], index: 4, kind: input, shape index: {}]   ;;  %s668_s5 = inlined_call_operand.<no memory space> [shape: f32[1], index: 5, kind: input, shape index: {}]   ;;  %s669_s6 = inlined_call_operand.vmem [shape: f32[8,1], index: 6, kind: output, shape index: {}]  }
   0x1   :  { %s21_s23 = sshll.u32 %s665_s2, 4  ;;  %s23_s25 = sshll.u32 %s401_s24, 4  ;;  %s22_s23 = int_to_ptr.hbm [resolvable:$true] %s21_s23  ;;  %s24_s25 = int_to_ptr.vmem [resolvable:$true] %s23_s25 }
   0x2   :  { %s403_s27 = smov 8  }
   0x3   :  { %29 = dma.hbm_to_vmem [thread:$0]  %s22_s23, 2048, %s24_s25, [#allocation5], %s402_s26, %s402_s26, %s403_s27  }
   0x4   :  { %399 = dma.done.wait [#allocation5], 2048  }
   0x5   :  { %400 = vsyncadd [#allocation5], 4294965248  ;;  %v443_v0 = vld [vmem:[#allocation4 + $0x78] sm:$0xff]  ;;  %v445_v1 = vld [vmem:[#allocation4 + $0x70] sm:$0xff]  ;;  %vm54_vm0 = vcmask 130048   ;;  %v404_v19 = vmov 0.0  }
   0x6   :  { %145 = vmatpush.msra.mxu1 %v443_v0  ;;  %168 = vmatpush.msra.mxu2 %v443_v0  ;;  %v449_v2 = vld [vmem:[#allocation4 + $0x68] sm:$0xff]  ;;  %v454_v3 = vld [vmem:[#allocation4 + $0x60] sm:$0xff]  ;;  %v467_v7 = vld [vmem:[#allocation4 + $0x58] sm:$0xff]  ;;  %vm338_vm1 = vcmask 7168  }
   0x7   :  { %191 = vmatpush.msra.mxu3 %v443_v0  ;;  %v49_v4 = vld [vmem:[%s664_s1 + $0x8] sm:$0xff]  ;;  %v48_v5 = vld [vmem:[%s664_s1] sm:$0xff]  ;;  %v472_v8 = vld [vmem:[#allocation4 + $0x50] sm:$0xff] }
   0x8   :  { %146 = vmatpush.msra.mxu1 %v445_v1  ;;  %169 = vmatpush.msra.mxu2 %v445_v1  ;;  %v40_v6 = vld [vmem:[%s663_s0] sm:$0xff]  ;;  %v478_v9 = vld [vmem:[#allocation4 + $0x48] sm:$0xff]  ;;  %v490_v11 = vld [vmem:[#allocation4 + $0x38] sm:$0xff] }
   0x9   :  { %192 = vmatpush.msra.mxu3 %v445_v1  ;;  %93 = vmatpush.msra.mxu0 %v49_v4  ;;  %v484_v10 = vld [vmem:[#allocation4 + $0x40] sm:$0xff]  ;;  %v496_v12 = vld [vmem:[#allocation4 + $0x30] sm:$0xff]  ;;  %v502_v13 = vld [vmem:[#allocation4 + $0x28] sm:$0xff] }
   0xa   :  { %147 = vmatpush.msra.mxu1 %v449_v2  ;;  %170 = vmatpush.msra.mxu2 %v449_v2  ;;  %v508_v14 = vld [vmem:[#allocation4 + $0x20] sm:$0xff]  ;;  %v514_v15 = vld [vmem:[#allocation4 + $0x18] sm:$0xff]  ;;  %v520_v16 = vld [vmem:[#allocation4 + $0x10] sm:$0xff] }
   0xb   :  { %193 = vmatpush.msra.mxu3 %v449_v2  ;;  %94 = vmatpush.msra.mxu0 %v48_v5  ;;  %v526_v17 = vld [vmem:[#allocation4 + $0x8] sm:$0xff]  ;;  %v532_v18 = vld [vmem:[#allocation4] sm:$0xff]  ;;  %v42_v27 = vld [vmem:[%s663_s0 + $0x10] sm:$0xff] }
   0xc   :  { %148 = vmatpush.msra.mxu1 %v454_v3  ;;  %345 = vmatmul.msk.f32.vlgmr.msra.gmra.mxu0 %vm54_vm0, %v40_v6  ;;  %v41_v20 = vld [vmem:[%s663_s0 + $0x8] sm:$0xff]  ;;  %v620_v21 = vld [vmem:[%s666_s3] ss:$0 sm:$0xff]  ;;  %v43_v33 = vld [vmem:[%s663_s0 + $0x18] sm:$0xff]  ;;  %v336_v6 = vstv %s668_s5 }
   0xd   :  { %171 = vmatpush.msra.mxu2 %v454_v3  ;;  %194 = vmatpush.msra.mxu3 %v454_v3  ;;  %v44_v39 = vld [vmem:[%s663_s0 + $0x20] sm:$0xff]  ;;  %v45_v45 = vld [vmem:[%s663_s0 + $0x28] sm:$0xff]  ;;  %v46_v46 = vld [vmem:[%s663_s0 + $0x30] sm:$0xff] }
   0xe   :  { %149 = vmatpush.msra.mxu1 %v467_v7  ;;  %283 = vmatpush.msrb.mxu0 %v443_v0  ;;  %v47_v52 = vld [vmem:[%s663_s0 + $0x38] sm:$0xff] }
   0xf   :  { %172 = vmatpush.msra.mxu2 %v467_v7  ;;  %195 = vmatpush.msra.mxu3 %v467_v7 }
  0x10   :  { %150 = vmatpush.msra.mxu1 %v472_v8  ;;  %284 = vmatpush.msrb.mxu0 %v445_v1 }
  0x11   :  { %173 = vmatpush.msra.mxu2 %v472_v8  ;;  %196 = vmatpush.msra.mxu3 %v472_v8 }
  0x12   :  { %151 = vmatpush.msra.mxu1 %v478_v9  ;;  %285 = vmatpush.msrb.mxu0 %v449_v2 }
  0x13   :  { %174 = vmatpush.msra.mxu2 %v478_v9  ;;  %197 = vmatpush.msra.mxu3 %v478_v9 }
  0x14   :  { %152 = vmatpush.msra.mxu1 %v484_v10  ;;  %286 = vmatpush.msrb.mxu0 %v454_v3 }
  0x15   :  { %175 = vmatpush.msra.mxu2 %v484_v10  ;;  %198 = vmatpush.msra.mxu3 %v484_v10 }
  0x16   :  { %153 = vmatpush.msra.mxu1 %v490_v11  ;;  %287 = vmatpush.msrb.mxu0 %v467_v7 }
  0x17   :  { %176 = vmatpush.msra.mxu2 %v490_v11  ;;  %199 = vmatpush.msra.mxu3 %v490_v11 }
  0x18   :  { %154 = vmatpush.msra.mxu1 %v496_v12  ;;  %288 = vmatpush.msrb.mxu0 %v472_v8 }
  0x19   :  { %177 = vmatpush.msra.mxu2 %v496_v12  ;;  %200 = vmatpush.msra.mxu3 %v496_v12 }
  0x1a   :  { %155 = vmatpush.msra.mxu1 %v502_v13  ;;  %289 = vmatpush.msrb.mxu0 %v478_v9 }
  0x1b   :  { %178 = vmatpush.msra.mxu2 %v502_v13  ;;  %201 = vmatpush.msra.mxu3 %v502_v13 }
  0x1c   :  { %156 = vmatpush.msra.mxu1 %v508_v14  ;;  %290 = vmatpush.msrb.mxu0 %v484_v10 }
  0x1d   :  { %179 = vmatpush.msra.mxu2 %v508_v14  ;;  %202 = vmatpush.msra.mxu3 %v508_v14 }
  0x1e   :  { %157 = vmatpush.msra.mxu1 %v514_v15  ;;  %291 = vmatpush.msrb.mxu0 %v490_v11 }
  0x1f   :  { %180 = vmatpush.msra.mxu2 %v514_v15  ;;  %203 = vmatpush.msra.mxu3 %v514_v15 }
  0x20   :  { %158 = vmatpush.msra.mxu1 %v520_v16  ;;  %292 = vmatpush.msrb.mxu0 %v496_v12 }
  0x21   :  { %181 = vmatpush.msra.mxu2 %v520_v16  ;;  %204 = vmatpush.msra.mxu3 %v520_v16 }
  0x22   :  { %159 = vmatpush.msra.mxu1 %v526_v17  ;;  %293 = vmatpush.msrb.mxu0 %v502_v13 }
  0x23   :  { %182 = vmatpush.msra.mxu2 %v526_v17  ;;  %205 = vmatpush.msra.mxu3 %v526_v17 }
  0x24   :  { %160 = vmatpush.msra.mxu1 %v532_v18  ;;  %294 = vmatpush.msrb.mxu0 %v508_v14 }
  0x25   :  { %161 = vmatmul.f32.vlgmr.msra.gmra.mxu1 %v404_v19  ;;  %183 = vmatpush.msra.mxu2 %v532_v18 }
  0x26   :  { %206 = vmatpush.msra.mxu3 %v532_v18  ;;  %214 = vmatpush.msrb.mxu1 %v443_v0 }
  0x27   :  { %237 = vmatpush.msrb.mxu2 %v443_v0  ;;  %295 = vmatpush.msrb.mxu0 %v514_v15 }
  0x28   :  { %260 = vmatpush.msrb.mxu3 %v443_v0  ;;  %215 = vmatpush.msrb.mxu1 %v445_v1 }
  0x29   :  { %238 = vmatpush.msrb.mxu2 %v445_v1  ;;  %296 = vmatpush.msrb.mxu0 %v520_v16 }
  0x2a   :  { %261 = vmatpush.msrb.mxu3 %v445_v1  ;;  %216 = vmatpush.msrb.mxu1 %v449_v2 }
  0x2b   :  { %239 = vmatpush.msrb.mxu2 %v449_v2  ;;  %297 = vmatpush.msrb.mxu0 %v526_v17 }
  0x2c   :  { %262 = vmatpush.msrb.mxu3 %v449_v2  ;;  %217 = vmatpush.msrb.mxu1 %v454_v3 }
  0x2d   :  { %240 = vmatpush.msrb.mxu2 %v454_v3  ;;  %298 = vmatpush.msrb.mxu0 %v532_v18 }
  0x2e   :  { %263 = vmatpush.msrb.mxu3 %v454_v3  ;;  %218 = vmatpush.msrb.mxu1 %v467_v7 }
  0x2f   :  { %241 = vmatpush.msrb.mxu2 %v467_v7  ;;  %346 = vmatmul.msk.f32.gmra.mxu0 %vm54_vm0, %v41_v20 }
  0x30   :  { %264 = vmatpush.msrb.mxu3 %v467_v7  ;;  %219 = vmatpush.msrb.mxu1 %v472_v8 }
  0x31   :  { %242 = vmatpush.msrb.mxu2 %v472_v8 }
  0x32   :  { %265 = vmatpush.msrb.mxu3 %v472_v8  ;;  %220 = vmatpush.msrb.mxu1 %v478_v9 }
  0x33   :  { %243 = vmatpush.msrb.mxu2 %v478_v9 }
  0x34   :  { %266 = vmatpush.msrb.mxu3 %v478_v9  ;;  %221 = vmatpush.msrb.mxu1 %v484_v10 }
  0x35   :  { %244 = vmatpush.msrb.mxu2 %v484_v10 }
  0x36   :  { %267 = vmatpush.msrb.mxu3 %v484_v10  ;;  %222 = vmatpush.msrb.mxu1 %v490_v11 }
  0x37   :  { %245 = vmatpush.msrb.mxu2 %v490_v11  ;;  %347 = vmatmul.msk.f32.gmra.mxu0 %vm54_vm0, %v42_v27 }
  0x38   :  { %268 = vmatpush.msrb.mxu3 %v490_v11  ;;  %223 = vmatpush.msrb.mxu1 %v496_v12 }
  0x39   :  { %246 = vmatpush.msrb.mxu2 %v496_v12 }
  0x3a   :  { %269 = vmatpush.msrb.mxu3 %v496_v12  ;;  %224 = vmatpush.msrb.mxu1 %v502_v13 }
  0x3b   :  { %247 = vmatpush.msrb.mxu2 %v502_v13 }
  0x3c   :  { %270 = vmatpush.msrb.mxu3 %v502_v13  ;;  %225 = vmatpush.msrb.mxu1 %v508_v14 }
  0x3d   :  { %248 = vmatpush.msrb.mxu2 %v508_v14 }
  0x3e   :  { %271 = vmatpush.msrb.mxu3 %v508_v14  ;;  %226 = vmatpush.msrb.mxu1 %v514_v15 }
  0x3f   :  { %249 = vmatpush.msrb.mxu2 %v514_v15  ;;  %348 = vmatmul.msk.f32.gmra.mxu0 %vm54_vm0, %v43_v33 }
  0x40   :  { %272 = vmatpush.msrb.mxu3 %v514_v15  ;;  %227 = vmatpush.msrb.mxu1 %v520_v16 }
  0x41   :  { %250 = vmatpush.msrb.mxu2 %v520_v16 }
  0x42   :  { %273 = vmatpush.msrb.mxu3 %v520_v16  ;;  %228 = vmatpush.msrb.mxu1 %v526_v17 }
  0x43   :  { %251 = vmatpush.msrb.mxu2 %v526_v17 }
  0x44   :  { %274 = vmatpush.msrb.mxu3 %v526_v17  ;;  %229 = vmatpush.msrb.mxu1 %v532_v18 }
  0x45   :  { %252 = vmatpush.msrb.mxu2 %v532_v18 }
  0x46   :  { %275 = vmatpush.msrb.mxu3 %v532_v18  ;;  %306 = vmatpush.msra.mxu1 %v443_v0 }
  0x47   :  { %349 = vmatmul.msk.f32.gmra.mxu0 %vm54_vm0, %v44_v39 }
  0x48   :  { %307 = vmatpush.msra.mxu1 %v445_v1 }
  0x4a   :  { %308 = vmatpush.msra.mxu1 %v449_v2 }
  0x4c   :  { %309 = vmatpush.msra.mxu1 %v454_v3  ;;  %v358_v3 = vld [vmem:[%s667_s4] ss:$0 sm:$0xff] }
  0x4e   :  { %310 = vmatpush.msra.mxu1 %v467_v7 }
  0x4f   :  { %350 = vmatmul.msk.f32.gmra.mxu0 %vm54_vm0, %v45_v45 }
  0x50   :  { %311 = vmatpush.msra.mxu1 %v472_v8 }
  0x52   :  { %312 = vmatpush.msra.mxu1 %v478_v9 }
  0x54   :  { %313 = vmatpush.msra.mxu1 %v484_v10 }
  0x56   :  { %314 = vmatpush.msra.mxu1 %v490_v11 }
  0x57   :  { %351 = vmatmul.msk.f32.gmra.mxu0 %vm54_vm0, %v46_v46 }
  0x58   :  { %315 = vmatpush.msra.mxu1 %v496_v12 }
  0x5a   :  { %316 = vmatpush.msra.mxu1 %v502_v13 }
  0x5c   :  { %317 = vmatpush.msra.mxu1 %v508_v14 }
  0x5e   :  { %318 = vmatpush.msra.mxu1 %v514_v15 }
  0x5f   :  { %352 = vmatmul.msk.f32.gmra.mxu0 %vm54_vm0, %v47_v52 }
  0x60   :  { %319 = vmatpush.msra.mxu1 %v520_v16 }
  0x62   :  { %320 = vmatpush.msra.mxu1 %v526_v17 }
  0x64   :  { %321 = vmatpush.msra.mxu1 %v532_v18 }
  0x89   :  { %v96_v22 = vpop.f32.mrf.mxu0 }
  0x8a   :  { %v97_v23 = vadd.f32 %v620_v21, %v96_v22 }
  0xa2   :  { %v162_v24 = vpop.f32.mrf.mxu1 }
  0xa3   :  { %v165_v25 = vadd.f32 %v162_v24, %v97_v23 }
  0xa5   :  { %359 = vtanh.f32 %v165_v25 }
  0xab   :  { %v360_v26 = vpop.eup %359 }
  0xac   :  { %184 = vmatmul.f32.vlgmr.msra.gmra.mxu2 %v360_v26  ;;  %v99_v28 = vpop.f32.mrf.mxu0 }
  0xad   :  { %v100_v29 = vadd.f32 %v620_v21, %v99_v28 }
  0xb4   :  { %v102_v34 = vpop.f32.mrf.mxu0 }
  0xb5   :  { %v103_v35 = vadd.f32 %v620_v21, %v102_v34 }
  0xbc   :  { %v105_v40 = vpop.f32.mrf.mxu0 }
  0xbd   :  { %v106_v41 = vadd.f32 %v620_v21, %v105_v40 }
  0xc4   :  { %v108_v47 = vpop.f32.mrf.mxu0 }
  0xc5   :  { %v109_v48 = vadd.f32 %v620_v21, %v108_v47 }
  0xcc   :  { %v111_v53 = vpop.f32.mrf.mxu0 }
  0xcd   :  { %v112_v54 = vadd.f32 %v620_v21, %v111_v53 }
  0xd4   :  { %v114_v58 = vpop.f32.mrf.mxu0 }
  0xd5   :  { %v115_v60 = vadd.f32 %v620_v21, %v114_v58 }
  0xdc   :  { %v117_v59 = vpop.f32.mrf.mxu0 }
  0xdd   :  { %v118_v0 = vadd.f32 %v620_v21, %v117_v59 }
 0x12f   :  { %v185_v30 = vpop.f32.mrf.mxu2 }
 0x130   :  { %v188_v31 = vadd.f32 %v185_v30, %v100_v29 }
 0x132   :  { %361 = vtanh.f32 %v188_v31 }
 0x138   :  { %v362_v32 = vpop.eup %361 }
 0x139   :  { %207 = vmatmul.f32.vlgmr.msra.gmra.mxu3 %v362_v32 }
 0x1bc   :  { %v208_v36 = vpop.f32.mrf.mxu3 }
 0x1bd   :  { %v211_v37 = vadd.f32 %v208_v36, %v103_v35 }
 0x1bf   :  { %363 = vtanh.f32 %v211_v37 }
 0x1c5   :  { %v364_v38 = vpop.eup %363 }
 0x1c6   :  { %230 = vmatmul.f32.vlgmr.msrb.gmra.mxu1 %v364_v38 }
 0x243   :  { %v231_v42 = vpop.f32.mrf.mxu1 }
 0x244   :  { %v234_v43 = vadd.f32 %v231_v42, %v106_v41 }
 0x246   :  { %365 = vtanh.f32 %v234_v43 }
 0x24c   :  { %v366_v44 = vpop.eup %365 }
 0x24d   :  { %253 = vmatmul.f32.vlgmr.msrb.gmra.mxu2 %v366_v44 }
 0x2d0   :  { %v254_v49 = vpop.f32.mrf.mxu2 }
 0x2d1   :  { %v257_v50 = vadd.f32 %v254_v49, %v109_v48 }
 0x2d3   :  { %367 = vtanh.f32 %v257_v50 }
 0x2d9   :  { %v368_v51 = vpop.eup %367 }
 0x2da   :  { %276 = vmatmul.f32.vlgmr.msrb.gmra.mxu3 %v368_v51 }
 0x35d   :  { %v277_v55 = vpop.f32.mrf.mxu3 }
 0x35e   :  { %v280_v56 = vadd.f32 %v277_v55, %v112_v54 }
 0x360   :  { %369 = vtanh.f32 %v280_v56 }
 0x366   :  { %v370_v57 = vpop.eup %369 }
 0x367   :  { %299 = vmatmul.f32.vlgmr.msrb.gmra.mxu0 %v370_v57 }
 0x3e4   :  { %v300_v61 = vpop.f32.mrf.mxu0 }
 0x3e5   :  { %v303_v62 = vadd.f32 %v300_v61, %v115_v60 }
 0x3e7   :  { %371 = vtanh.f32 %v303_v62 }
 0x3ed   :  { %v372_v63 = vpop.eup %371 }
 0x3ee   :  { %322 = vmatmul.f32.vlgmr.msra.gmra.mxu1 %v372_v63 }
 0x46b   :  { %v323_v1 = vpop.f32.mrf.mxu1 }
 0x46c   :  { %v326_v2 = vadd.f32 %v323_v1, %v118_v0 }
 0x46e   :  { %373 = vtanh.f32 %v326_v2 }
 0x474   :  { %v374_v4 = vpop.eup %373 }
 0x475   :  { %v332_v5 = vmul.f32 %v374_v4, %v358_v3 }
 0x477   :  { %333 = vadd.xlane.f32.xlu0 %v332_v5 }
 0x4ea   :  { %v334_v7 = vpop.xlane.xlu0 %333 }
 0x4eb   :  { %v337_v8 = vadd.f32 %v336_v6, %v334_v7 }
 0x4ed   :  { %339 = vst.msk [vmem:[%s669_s6] sm:$0xff] %vm338_vm1, %v337_v8 }
 0x4ee   :  { %344 = vsyncpa [#allocation5], 1 }

</bundles_post_ra>
